<compile_context>
chip_gen: v6e
topology: v6e:2x2x1
jax: 0.10.0
libtpu: 0.0.40
codegen_flags: <defaults>
</compile_context>

<pallas_src>
import jax
import jax.numpy as jnp
from jax.experimental import pallas as pl
from jax.experimental.pallas import tpu as pltpu

IN_FEATURES = 16
HIDDEN = 10
OUT_FEATURES = 10


def _round_up(n, m):
    return ((n + m - 1) // m) * m


def _mlp_kernel(x_ref, w1_ref, b1_ref, w2_ref, o_ref):
    # x_ref : [16, TB]  (batch on lanes)
    # w1_ref: [10, 16]  (PyTorch (out, in) layout)
    # b1_ref: [10, 1]
    # w2_ref: [10, 10]
    # o_ref : [10, TB]
    x = x_ref[...].astype(jnp.float32)          # cast after DMA (bf16 inputs OK)
    h = jnp.dot(w1_ref[...], x, preferred_element_type=jnp.float32)
    h = jnp.maximum(h + b1_ref[...], 0.0)       # bias broadcast over lanes + ReLU
    y = jnp.dot(w2_ref[...], h, preferred_element_type=jnp.float32)
    o_ref[...] = y.astype(o_ref.dtype)


def model_forward_pallas(x, w1, b1, w2, *, max_tile_b=8192):
    """Pallas path. x: any shape with prod(shape[1:]) == 16. Returns [B, 10].

    w1: (10, 16), b1: (10,), w2: (10, 10)  -- PyTorch (out, in) layouts.
    """
    B = x.shape[0]
    x2d = x.reshape(B, -1)
    assert x2d.shape[1] == IN_FEATURES, "flattened feature dim must be 16"

    # Batch tile: 128-aligned (lane width); cap so per-step VMEM stays tiny
    # (input 16*TB*4 B + output 10*TB*4 B, double-buffered -> ~3.3 MiB @ 8192).
    tb = min(max_tile_b, _round_up(B, 128))
    b_pad = _round_up(B, tb)
    n_tiles = b_pad // tb

    # Batch-on-lanes layout (layout plumbing in the wrapper, not compute).
    x_t = jnp.pad(x2d.T, ((0, 0), (0, b_pad - B)))          # [16, B_pad]
    w1f = w1.astype(jnp.float32)                             # [10, 16]
    b1c = b1.reshape(HIDDEN, 1).astype(jnp.float32)          # [10, 1]
    w2f = w2.astype(jnp.float32)                             # [10, 10]

    itemsize = jnp.dtype(x_t.dtype).itemsize
    weight_bytes = (HIDDEN * IN_FEATURES + HIDDEN + OUT_FEATURES * HIDDEN) * 4

    out_t = pl.pallas_call(
        _mlp_kernel,
        out_shape=jax.ShapeDtypeStruct((OUT_FEATURES, b_pad), jnp.float32),
        grid=(n_tiles,),
        in_specs=[
            pl.BlockSpec((IN_FEATURES, tb), lambda i: (0, i)),        # streamed
            pl.BlockSpec((HIDDEN, IN_FEATURES), lambda i: (0, 0)),    # resident
            pl.BlockSpec((HIDDEN, 1), lambda i: (0, 0)),              # resident
            pl.BlockSpec((OUT_FEATURES, HIDDEN), lambda i: (0, 0)),   # resident
        ],
        out_specs=pl.BlockSpec((OUT_FEATURES, tb), lambda i: (0, i)),
        compiler_params=pltpu.CompilerParams(
            dimension_semantics=("parallel",),        # 2 TCs split batch on v7x
            vmem_limit_bytes=32 * 1024 * 1024,
        ),
        cost_estimate=pl.CostEstimate(
            flops=2 * b_pad * (IN_FEATURES * HIDDEN + HIDDEN * OUT_FEATURES),
            transcendentals=0,
            bytes_accessed=b_pad * IN_FEATURES * itemsize
            + b_pad * OUT_FEATURES * 4
            + weight_bytes,
        ),
    )(x_t, w1f, b1c, w2f)

    # Drop padded lanes, back to [B, 10].
    return out_t[:, :B].T


def model_forward(x, w1, b1, w2, *, min_pallas_batch=1024):
    """Dispatcher: tiny batches are cheaper as plain fused XLA than a Pallas call."""
    B = x.shape[0]
    if B < min_pallas_batch:
        x2d = x.reshape(B, -1).astype(jnp.float32)
        return jnp.maximum(x2d @ w1.T.astype(jnp.float32) + b1[None, :], 0.0) @ \
            w2.T.astype(jnp.float32)
    return model_forward_pallas(x, w1, b1, w2)


def init_params(key):
    """Deterministic init matching PyTorch shapes/layouts: W is (out, in)."""
    k1, k2, k3 = jax.random.split(key, 3)
    lim1 = 1.0 / jnp.sqrt(float(IN_FEATURES))
    w1 = jax.random.uniform(k1, (HIDDEN, IN_FEATURES), jnp.float32, -lim1, lim1)
    b1 = jax.random.uniform(k2, (HIDDEN,), jnp.float32, -lim1, lim1)
    lim2 = 1.0 / jnp.sqrt(float(HIDDEN))
    w2 = jax.random.uniform(k3, (OUT_FEATURES, HIDDEN), jnp.float32, -lim2, lim2)
    return w1, b1, w2


def _reference(x, w1, b1, w2):
    x2d = x.reshape(x.shape[0], -1).astype(jnp.float32)
    return jnp.maximum(x2d @ w1.T + b1[None, :], 0.0) @ w2.T


if __name__ == "__main__":
    key = jax.random.PRNGKey(0)
    kx, kx2, kp = jax.random.split(key, 3)
    w1, b1, w2 = init_params(kp)

    # Case 1: tiny batch, module-shaped input (2, 4, 4) -> flatten to 16 features.
    x = jax.random.normal(kx, (2, 4, 4), jnp.float32)
    y = jax.block_until_ready(model_forward_pallas(x, w1, b1, w2))
    ref = _reference(x, w1, b1, w2)
    assert y.shape == (2, 10)
    assert jnp.allclose(y, ref, atol=1e-5, rtol=1e-5)

    # Case 2: batch not a multiple of 128 (exercises lane padding / slicing).
    x2 = jax.random.normal(kx2, (300, 16), jnp.float32)
    y2 = jax.block_until_ready(model_forward_pallas(x2, w1, b1, w2))
    ref2 = _reference(x2, w1, b1, w2)
    assert y2.shape == (300, 10)
    assert jnp.allclose(y2, ref2, atol=1e-5, rtol=1e-5)

    # Dispatcher sanity (uses fused XLA path for tiny batch).
    yd = jax.block_until_ready(model_forward(x, w1, b1, w2))
    assert jnp.allclose(yd, ref, atol=1e-5, rtol=1e-5)

    print("KERNEL_OK")
</pallas_src>

<mosaic_0001>
module attributes {stable_mosaic.version = 11 : i64} {
  func.func @_mlp_kernel(%arg0: i32, %arg1: memref<16x128xf32, #tpu.memory_space<vmem>>, %arg2: memref<10x16xf32, #tpu.memory_space<vmem>>, %arg3: memref<10x1xf32, #tpu.memory_space<vmem>>, %arg4: memref<10x10xf32, #tpu.memory_space<vmem>>, %arg5: memref<10x128xf32, #tpu.memory_space<vmem>>) attributes {dimension_semantics = [#tpu.dimension_semantics<parallel>], iteration_bounds = array<i64: 1>, scalar_prefetch = 0 : i64, scratch_operands = 0 : i64, tpu.core_type = #tpu.core_type<tc>, window_params = [{transform_indices = @transform_0, window_bounds = array<i64: 16, 128>}, {pipeline_mode = #tpu.pipeline_mode<synchronous>, transform_indices = @transform_1, window_bounds = array<i64: 10, 16>}, {pipeline_mode = #tpu.pipeline_mode<synchronous>, transform_indices = @transform_2, window_bounds = array<i64: 10, 1>}, {pipeline_mode = #tpu.pipeline_mode<synchronous>, transform_indices = @transform_3, window_bounds = array<i64: 10, 10>}, {transform_indices = @transform_4, window_bounds = array<i64: 10, 128>}]} {
    %c0 = arith.constant 0 : index
    %c0_0 = arith.constant 0 : index
    %0 = vector.load %arg1[%c0, %c0_0] : memref<16x128xf32, #tpu.memory_space<vmem>>, vector<16x128xf32>
    %c0_1 = arith.constant 0 : index
    %c0_2 = arith.constant 0 : index
    %1 = vector.load %arg2[%c0_1, %c0_2] : memref<10x16xf32, #tpu.memory_space<vmem>>, vector<10x16xf32>
    %cst = arith.constant dense<0.000000e+00> : vector<10x128xf32>
    %2 = tpu.matmul %1, %0, %cst {dimension_numbers = #tpu.dot_dimension_numbers<[1], [0], [0], [1], [0, 0, 1, 1], [], []>} : vector<10x16xf32>, vector<16x128xf32>, vector<10x128xf32> -> vector<10x128xf32>
    %c0_3 = arith.constant 0 : index
    %c0_4 = arith.constant 0 : index
    %3 = vector.load %arg3[%c0_3, %c0_4] : memref<10x1xf32, #tpu.memory_space<vmem>>, vector<10x1xf32>
    %4 = vector.broadcast %3 : vector<10x1xf32> to vector<10x128xf32>
    %5 = arith.addf %2, %4 : vector<10x128xf32>
    %cst_5 = arith.constant 0.000000e+00 : f32
    %6 = vector.broadcast %cst_5 : f32 to vector<10x128xf32>
    %7 = arith.maximumf %5, %6 : vector<10x128xf32>
    %c0_6 = arith.constant 0 : index
    %c0_7 = arith.constant 0 : index
    %8 = vector.load %arg4[%c0_6, %c0_7] : memref<10x10xf32, #tpu.memory_space<vmem>>, vector<10x10xf32>
    %cst_8 = arith.constant dense<0.000000e+00> : vector<10x128xf32>
    %9 = tpu.matmul %8, %7, %cst_8 {dimension_numbers = #tpu.dot_dimension_numbers<[1], [0], [0], [1], [0, 0, 1, 1], [], []>} : vector<10x10xf32>, vector<10x128xf32>, vector<10x128xf32> -> vector<10x128xf32>
    %c0_9 = arith.constant 0 : index
    %c0_10 = arith.constant 0 : index
    %10 = vector.load %arg5[%c0_9, %c0_10] : memref<10x128xf32, #tpu.memory_space<vmem>>, vector<10x128xf32>
    tpu.vector_store %arg5[%c0_9, %c0_10], %9 {strides = array<i32>} : memref<10x128xf32, #tpu.memory_space<vmem>>, vector<10x128xf32>,
    return
  }
  func.func @transform_0(%arg0: i32) -> (i32, i32) {
    %c0_i32 = arith.constant 0 : i32
    %c0_i32_0 = arith.constant 0 : i32
    return %c0_i32, %arg0 : i32, i32
  }
  func.func @transform_1(%arg0: i32) -> (i32, i32) {
    %c0_i32 = arith.constant 0 : i32
    %c0_i32_0 = arith.constant 0 : i32
    %c0_i32_1 = arith.constant 0 : i32
    return %c0_i32, %c0_i32_0 : i32, i32
  }
  func.func @transform_2(%arg0: i32) -> (i32, i32) {
    %c0_i32 = arith.constant 0 : i32
    %c0_i32_0 = arith.constant 0 : i32
    %c0_i32_1 = arith.constant 0 : i32
    return %c0_i32, %c0_i32_0 : i32, i32
  }
  func.func @transform_3(%arg0: i32) -> (i32, i32) {
    %c0_i32 = arith.constant 0 : i32
    %c0_i32_0 = arith.constant 0 : i32
    %c0_i32_1 = arith.constant 0 : i32
    return %c0_i32, %c0_i32_0 : i32, i32
  }
  func.func @transform_4(%arg0: i32) -> (i32, i32) {
    %c0_i32 = arith.constant 0 : i32
    %c0_i32_0 = arith.constant 0 : i32
    return %c0_i32, %arg0 : i32, i32
  }
}

</mosaic_0001>

<bundles_post_ra>
// kernel: tpu_custom_call.1
= control target key start
LH: loop header
LB: loop body
LE: loop exit
PB: predicated region body
PF: predicated region fallthrough
CT: control target
= control target key end

     0   :  { %9 = vsyncpa [#allocation3], 0  ;;  %s417_s0 = inlined_call_operand.vmem [shape: f32[16,128], index: 0, kind: input, shape index: {}]   ;;  %s418_s1 = inlined_call_operand.hbm [shape: f32[10,16], index: 1, kind: input, shape index: {}]   ;;  %s419_s2 = inlined_call_operand.vmem [shape: f32[10,1], index: 2, kind: input, shape index: {}]   ;;  %s420_s3 = inlined_call_operand.hbm [shape: f32[10,10], index: 3, kind: input, shape index: {}]   ;;  %s421_s4 = inlined_call_operand.hbm [shape: f32[10,128], index: 4, kind: output, shape index: {}]  }
   0x1   :  { %10 = vsyncpa [#allocation6], 0 }
   0x2   :  { %11 = vsyncpa [#allocation4], 0  ;;  %s354_s15 = smov [#allocation2]  }
   0x3   :  { %s19_s16 = sshll.u32 %s354_s15, 4  ;;  %s20_s16 = int_to_ptr.vmem [resolvable:$true] %s19_s16 }
   0x4   :  { %s296_s17 = scalar_lea.vmem %s20_s16, 256  ;;  %p301_p1 = scmp.lt.s32.totalorder %s20_s16, %s20_s16 }
   0x5   :  { %p297_p0 = scmp.ne.s32.totalorder %s20_s16, %s296_s17  ;;  %p302_p2 = scmp.lt.s32.totalorder %s296_s17, %s296_s17 }
   0x7   :  { %p303_p3 = por %p302_p2, %p301_p1 }
   0x9   :  { %p304_p4 = pnand %p303_p3, %p297_p0 }
   0xb   :  { %307 = shalt.err (!%p304_p4)
}
   0xc   :  { %s355_s18 = smov 128   ;;  %s356_s19 = smov 8  }
   0xd   :  { %25 = dma.hbm_to_vmem [thread:$0]  %s418_s1, 256, %s20_s16, [#allocation3], %s355_s18, %s355_s18, %s356_s19  }
   0xe   :  { %s357_s22 = smov [#allocation5]  }
   0xf   :  { %s33_s23 = sshll.u32 %s357_s22, 4  ;;  %s34_s23 = int_to_ptr.vmem [resolvable:$true] %s33_s23 }
  0x10   :  { %s316_s24 = scalar_lea.vmem %s34_s23, 256  ;;  %p321_p6 = scmp.lt.s32.totalorder %s34_s23, %s34_s23 }
  0x11   :  { %p317_p5 = scmp.ne.s32.totalorder %s34_s23, %s316_s24  ;;  %p322_p7 = scmp.lt.s32.totalorder %s316_s24, %s316_s24 }
  0x13   :  { %p323_p8 = por %p322_p7, %p321_p6 }
  0x15   :  { %p324_p9 = pnand %p323_p8, %p317_p5 }
  0x17   :  { %327 = shalt.err (!%p324_p9)
}
  0x18   :  { %39 = dma.hbm_to_vmem [thread:$0]  %s420_s3, 256, %s34_s23, [#allocation6], %s355_s18, %s355_s18, %s356_s19  }
  0x19   :  { %348 = dma.done.wait [#allocation3], 256  }
  0x1a   :  { %349 = vsyncadd [#allocation3], 4294967040 }
  0x1b   :  { %350 = dma.done.wait [#allocation6], 256  }
  0x1c   :  { %351 = vsyncadd [#allocation6], 4294967040  ;;  %v358_v0 = vmov 0   ;;  %vm62_vm0 = vcmask 130048   ;;  %v47_v1 = vld [vmem:[%s417_s0 + $0x8] sm:$0xff]  ;;  %v46_v2 = vld [vmem:[%s417_s0] sm:$0xff] }
  0x1d   :  { %287 = vset.pattern.permute.xlu0 %v358_v0  ;;  %v48_v3 = vld [vmem:[#allocation2] sm:$0xff]  ;;  %267 = vmatprep.subr.mxu0 %v47_v1  ;;  %v51_v4 = vld [vmem:[%s419_s2 + $0x8] sm:$0x3]  ;;  %v146_v7 = vld [vmem:[#allocation5] sm:$0xff]  ;;  %vm148_vm1 = vcmask 80896   ;;  %vm155_vm2 = vcmask 1041408  }
  0x1e   :  { %271 = vmatprep.mubr.msk.f32.mxu0 %vm62_vm0, %v48_v3  ;;  %268 = vmatpush3.msra.mxu0 %v47_v1  ;;  %v49_v5 = vld [vmem:[#allocation2 + $0x8] sm:$0x3]  ;;  %v50_v6 = vld [vmem:[%s419_s2] sm:$0xff]  ;;  %v147_v16 = vld [vmem:[#allocation5 + $0x8] sm:$0x3]  ;;  %s359_s0 = smov [#allocation7]  }
  0x1f   :  { %59 = vperm.xlu0 %287, %v51_v4   ;;  %269 = vmatprep.subr.mxu0 %v46_v2  ;;  %s241_s2 = sshll.u32 %s359_s0, 4  ;;  %s242_s2 = int_to_ptr.vmem [resolvable:$true] %s241_s2 }
  0x20   :  { %270 = vmatpush3.msra.mxu0 %v46_v2  ;;  %278 = vmatprep.mubr.msk.f32.mxu1 %vm148_vm1, %v146_v7  ;;  %s328_s7 = scalar_lea.vmem %s242_s2, 256  ;;  %p333_p11 = scmp.lt.s32.totalorder %s242_s2, %s242_s2 }
  0x21   :  { %272 = vmatmul.mubr.msk.f32.vlgmr.msra.gmra.mxu0 %vm62_vm0, %v49_v5  ;;  %p329_p10 = scmp.ne.s32.totalorder %s242_s2, %s328_s7  ;;  %p334_p12 = scmp.lt.s32.totalorder %s328_s7, %s328_s7 }
  0x23   :  { %54 = vperm.xlu0 %287, %v50_v6   ;;  %p335_p13 = por %p334_p12, %p333_p11 }
  0x25   :  { %p336_p0 = pnand %p335_p13, %p329_p10 }
  0x9a   :  { %v60_v8 = vpop.permute.xlu0 %59 }
  0x9e   :  { %v55_v11 = vpop.permute.xlu0 %54 }
  0xe1   :  { %v273_v9 = vpop.f32.mrf.mxu0 }
  0xe2   :  { %v141_v10 = vadd.f32 %v273_v9, %v60_v8 }
  0xe3   :  { %v135_v12 = vpop.f32.mrf.mxu0 }
  0xe4   :  { %v145_v13 = vmax.f32 %v141_v10, 0.0  ;;  %v136_v14 = vadd.f32 %v135_v12, %v55_v11 }
  0xe6   :  { %v144_v15 = vmax.f32 %v136_v14, 0.0  ;;  %274 = vmatprep.subr.msk.mxu1 %vm155_vm2, %v145_v13 }
  0xe7   :  { %275 = vmatpush3.msk.msra.mxu1 %vm155_vm2, %v145_v13 }
  0xe8   :  { %276 = vmatprep.subr.mxu1 %v144_v15 }
  0xe9   :  { %277 = vmatpush3.msra.mxu1 %v144_v15 }
  0xea   :  { %279 = vmatmul.mubr.msk.f32.vlgmr.msra.gmra.mxu1 %vm148_vm1, %v147_v16 }
 0x1aa   :  { %v280_v17 = vpop.f32.mrf.mxu1 }
 0x1ab   :  { %235 = vst [vmem:[#allocation7 + $0x8] sm:$0x3] %v280_v17 }
 0x1ac   :  { %v225_v18 = vpop.f32.mrf.mxu1 }
 0x1ad   :  { %234 = vst [vmem:[#allocation7] sm:$0xff] %v225_v18 }
 0x1ae   :  { %339 = shalt.err (!%p336_p0)
}
 0x1af   :  { %247 = dma.vmem_to_hbm [thread:$0]  %s242_s2, 256, %s421_s4, [#allocation4], %s355_s18, %s355_s18, %s356_s19  }
 0x1b0   :  { %352 = dma.done.wait [#allocation4], 256  }
 0x1b1   :  { %353 = vsyncadd [#allocation4], 4294967040 }
 0x1b2   :  { %251 = vsyncpa [#allocation3], 1 }
 0x1b3   :  { %252 = vsyncpa [#allocation6], 1 }
 0x1b4   :  { %253 = vsyncpa [#allocation4], 1 }

</bundles_post_ra>
